<compile_context>
chip_gen: v7x
topology: tpu7x:2x2x1
jax: 0.10.0
libtpu: 0.0.40
codegen_flags: <defaults>
</compile_context>

<pallas_src>
import math

import jax
import jax.numpy as jnp
from jax.experimental import pallas as pl
from jax.experimental.pallas import tpu as pltpu

_LANES = 128
_SUB = 8  # f32 sublane group


def _cdiv(a, b):
    return -(-a // b)


def _round_up(a, b):
    return _cdiv(a, b) * b


def _make_kernel(gamma, rows, tile_rows, blocks_per_split, binary_targets):
    n_groups = tile_rows // _SUB

    def kernel(x_ref, t_ref, o_ref):
        c = pl.program_id(0)   # split / TensorCore axis ("parallel")
        i = pl.program_id(1)   # streaming axis ("arbitrary")

        # o_ref's block index is constant along i, so it stays resident in VMEM
        # across the inner loop: accumulate directly into it (no scratch).
        @pl.when(i == 0)
        def _():
            o_ref[...] = jnp.zeros_like(o_ref)

        x = x_ref[...].astype(jnp.float32)
        t = t_ref[...].astype(jnp.float32)

        # Shared softplus term: sp = log1p(exp(-|x|)).
        sp = jnp.log1p(jnp.exp(-jnp.abs(x)))
        xt = x * t
        # BCE-with-logits: x - x*t + max(-x,0) + log(exp(-max)+exp(-x-max))
        #                = max(x,0) - x*t + log1p(exp(-|x|))
        loss = jnp.maximum(x, 0.0) - xt + sp
        # z = -x*(2t-1) = x - 2*x*t ; logsigmoid(z) = min(z,0) - log1p(exp(-|z|))
        z = x - 2.0 * xt
        if binary_targets:
            # t in {0,1} -> |z| == |x|: reuse sp (saves one exp + one log / elem).
            invprobs = jnp.minimum(z, 0.0) - sp
        else:
            invprobs = jnp.minimum(z, 0.0) - jnp.log1p(jnp.exp(-jnp.abs(z)))
        loss = jnp.exp(invprobs * gamma) * loss

        # Row-granular validity of this block (int32 is safe: these are row
        # indices, so no overflow below ~2^31 * 128 elements).
        block = c * blocks_per_split + i        # un-clamped global block id
        valid = rows - block * tile_rows        # rows of this block still in range

        def psum(v):
            # vreg-shaped partial sum: pure VPU adds, no cross-lane reduce.
            return jnp.sum(v.reshape(n_groups, _SUB, _LANES), axis=0)

        # Interior blocks: completely mask-free.
        @pl.when(valid >= tile_rows)
        def _():
            o_ref[...] += psum(loss)

        # Tail block only: mask rows past the end of the array (their VMEM
        # contents are unspecified).  Fully out-of-range steps (valid <= 0,
        # possible when num_splits does not divide the block count) add nothing.
        @pl.when(jnp.logical_and(valid > 0, valid < tile_rows))
        def _():
            rid = jax.lax.broadcasted_iota(jnp.int32, (tile_rows, _LANES), 0)
            o_ref[...] += psum(jnp.where(rid < valid, loss, 0.0))

    return kernel


def focal_loss(inp, target, gamma, *, max_tile_rows=4096, num_splits=2,
               binary_targets=True):
    """Mean sigmoid focal loss == FocalLoss(gamma)(input, target).

    Inputs are consumed in their original dtype (f32 / bf16 / int8 targets all
    work; the f32 upcast happens in VMEM).  binary_targets=True assumes target
    values are in {0, 1} (transcendental-sharing fast path); pass False for
    soft targets (exact general formula).
    """
    if inp.shape != target.shape:
        raise ValueError(
            "Target size ({}) must be the same as input size ({})".format(
                target.shape, inp.shape))

    total = int(math.prod(inp.shape))
    assert total > 0

    x_flat = jnp.ravel(inp)
    t_flat = jnp.ravel(target)

    # Pad only up to one sublane group (1024 elems).  Already-aligned shapes get
    # zero wrapper copies; padded zero elements are corrected in closed form
    # after the kernel instead of being masked inside it.
    padded_total = _round_up(total, _SUB * _LANES)
    pad = padded_total - total
    if pad:
        x_flat = jnp.pad(x_flat, (0, pad))
        t_flat = jnp.pad(t_flat, (0, pad))
    rows = padded_total // _LANES                 # always a multiple of 8

    x2d = x_flat.reshape(rows, _LANES)
    t2d = t_flat.reshape(rows, _LANES)

    # Block sizing: biggest lane-dense block inside the VMEM budget.  The cap is
    # floored to a multiple of 32 rows so f32/bf16/int8 inputs all satisfy the
    # (sublane, lane) block constraint; small inputs use the full row count
    # (full-dimension blocks are always legal).
    max_tile_rows = max(_SUB, (int(max_tile_rows) // _SUB) * _SUB)
    if max_tile_rows >= 32:
        max_tile_rows = (max_tile_rows // 32) * 32
    tile_rows = rows if rows <= max_tile_rows else max_tile_rows

    total_blocks = _cdiv(rows, tile_rows)
    num_splits = max(1, min(int(num_splits), total_blocks))
    blocks_per_split = _cdiv(total_blocks, num_splits)
    last_block = total_blocks - 1

    def in_map(c, i):
        # Clamp so the (rare) over-run steps of the last split stay in bounds;
        # the kernel skips their accumulation (valid <= 0).
        return (jnp.minimum(c * blocks_per_split + i, last_block), 0)

    partials = pl.pallas_call(
        _make_kernel(float(gamma), rows, tile_rows, blocks_per_split,
                     bool(binary_targets)),
        out_shape=jax.ShapeDtypeStruct((num_splits * _SUB, _LANES), jnp.float32),
        grid_spec=pltpu.PrefetchScalarGridSpec(
            num_scalar_prefetch=0,
            grid=(num_splits, blocks_per_split),
            in_specs=[
                pl.BlockSpec((tile_rows, _LANES), in_map),
                pl.BlockSpec((tile_rows, _LANES), in_map),
            ],
            out_specs=pl.BlockSpec((_SUB, _LANES), lambda c, i: (c, 0)),
        ),
        # TODO(synk): on v7x confirm in xprof that the leading "parallel" axis
        # shards across both TensorCores; if not, switch it to
        # pltpu.CORE_PARALLEL (each split already owns its own output block).
        compiler_params=pltpu.CompilerParams(
            dimension_semantics=("parallel", "arbitrary")),
    )(x2d, t2d)

    # One tiny cross-lane reduce + the mean divide happen once, in the wrapper.
    loss_sum = jnp.sum(partials)
    if pad:
        # Each zero-padded element (x=0, t=0) contributes exactly
        # log(2) * exp(-gamma * log(2)); remove it in closed form.
        sp0 = jnp.log1p(jnp.exp(jnp.float32(0.0)))           # log(2)
        pad_each = jnp.exp(jnp.float32(-gamma) * sp0) * sp0
        loss_sum = loss_sum - jnp.float32(pad) * pad_each
    return loss_sum / jnp.float32(total)


def focal_loss_ref(inp, target, gamma):
    x = inp.astype(jnp.float32)
    t = target.astype(jnp.float32)
    max_val = jnp.maximum(-x, 0.0)
    loss = (x - x * t + max_val
            + jnp.log(jnp.exp(-max_val) + jnp.exp(-x - max_val)))
    invprobs = jax.nn.log_sigmoid(-x * (t * 2.0 - 1.0))
    loss = jnp.exp(invprobs * gamma) * loss
    return jnp.mean(loss)


if __name__ == "__main__":
    key = jax.random.PRNGKey(0)
    k1, k2, k3, k4 = jax.random.split(key, 4)
    gamma = 2.0

    # 1) Module-shaped case: NCHW logits + binary targets.  Element count is a
    #    multiple of 1024, so there is no wrapper-side pad/copy at all.
    x = jax.random.normal(k1, (2, 4, 16, 16), dtype=jnp.float32) * 2.0
    tgt = (jax.random.uniform(k2, (2, 4, 16, 16)) > 0.5).astype(jnp.float32)
    out = jax.block_until_ready(focal_loss(x, tgt, gamma))
    ref = focal_loss_ref(x, tgt, gamma)
    assert jnp.allclose(out, ref, atol=1e-5, rtol=1e-5), (out, ref)

    # 2) Non-aligned shape + soft targets: exercises the minimal pad, the
    #    closed-form pad correction and the exact (non-binary) path.
    x2 = jax.random.normal(k3, (2, 3, 7, 5), dtype=jnp.float32)
    tgt2 = jax.random.uniform(k4, (2, 3, 7, 5), dtype=jnp.float32)
    out2 = jax.block_until_ready(
        focal_loss(x2, tgt2, gamma, binary_targets=False))
    ref2 = focal_loss_ref(x2, tgt2, gamma)
    assert jnp.allclose(out2, ref2, atol=1e-5, rtol=1e-5), (out2, ref2)

    # 3) Multi-block grid with a partial tail block and a 2-way split:
    #    exercises the pl.when-guarded tail masking and direct o_ref accumulation.
    x3 = jax.random.normal(k1, (3, 4, 16, 16), dtype=jnp.float32)
    tgt3 = (jax.random.uniform(k2, (3, 4, 16, 16)) > 0.5).astype(jnp.float32)
    out3 = jax.block_until_ready(focal_loss(x3, tgt3, gamma, max_tile_rows=16))
    ref3 = focal_loss_ref(x3, tgt3, gamma)
    assert jnp.allclose(out3, ref3, atol=1e-5, rtol=1e-5), (out3, ref3)

    # 4) bf16 logits + bf16 binary targets: no wrapper upcast (half the HBM traffic).
    x4 = x.astype(jnp.bfloat16)
    tgt4 = tgt.astype(jnp.bfloat16)
    out4 = jax.block_until_ready(focal_loss(x4, tgt4, gamma))
    ref4 = focal_loss_ref(x4.astype(jnp.float32), tgt4.astype(jnp.float32), gamma)
    assert jnp.allclose(out4, ref4, atol=1e-5, rtol=1e-5), (out4, ref4)

    print("KERNEL_OK")
</pallas_src>

<mosaic_0001>
module attributes {stable_mosaic.version = 11 : i64} {
  func.func @kernel(%arg0: i32, %arg1: i32, %arg2: memref<16x128xf32, #tpu.memory_space<vmem>>, %arg3: memref<16x128xf32, #tpu.memory_space<vmem>>, %arg4: memref<8x128xf32, #tpu.memory_space<vmem>>) attributes {dimension_semantics = [#tpu.dimension_semantics<parallel>, #tpu.dimension_semantics<arbitrary>], iteration_bounds = array<i64: 1, 1>, scalar_prefetch = 0 : i64, scratch_operands = 0 : i64, tpu.core_type = #tpu.core_type<tc>, window_params = [{transform_indices = @transform_0, window_bounds = array<i64: 16, 128>}, {transform_indices = @transform_1, window_bounds = array<i64: 16, 128>}, {transform_indices = @transform_2, window_bounds = array<i64: 8, 128>}]} {
    %c0_i32 = arith.constant 0 : i32
    %0 = arith.cmpi eq, %arg1, %c0_i32 : i32
    %1 = arith.extui %0 : i1 to i32
    %c0_i32_0 = arith.constant 0 : i32
    %2 = arith.cmpi ne, %1, %c0_i32_0 : i32
    scf.if %2 {
      %cst_14 = arith.constant 0.000000e+00 : f32
      %37 = vector.broadcast %cst_14 : f32 to vector<8x128xf32>
      %c0_15 = arith.constant 0 : index
      %c0_16 = arith.constant 0 : index
      %38 = vector.load %arg4[%c0_15, %c0_16] : memref<8x128xf32, #tpu.memory_space<vmem>>, vector<8x128xf32>
      tpu.vector_store %arg4[%c0_15, %c0_16], %37 {strides = array<i32>} : memref<8x128xf32, #tpu.memory_space<vmem>>, vector<8x128xf32>,
    } else {
    }
    %c0 = arith.constant 0 : index
    %c0_1 = arith.constant 0 : index
    %3 = vector.load %arg2[%c0, %c0_1] : memref<16x128xf32, #tpu.memory_space<vmem>>, vector<16x128xf32>
    %c0_2 = arith.constant 0 : index
    %c0_3 = arith.constant 0 : index
    %4 = vector.load %arg3[%c0_2, %c0_3] : memref<16x128xf32, #tpu.memory_space<vmem>>, vector<16x128xf32>
    %5 = math.absf %3 : vector<16x128xf32>
    %cst = arith.constant 0.000000e+00 : f32
    %6 = vector.broadcast %cst : f32 to vector<16x128xf32>
    %7 = arith.subf %6, %5 : vector<16x128xf32>
    %8 = math.exp %7 : vector<16x128xf32>
    %9 = math.log1p %8 : vector<16x128xf32>
    %10 = arith.mulf %3, %4 : vector<16x128xf32>
    %cst_4 = arith.constant 0.000000e+00 : f32
    %11 = vector.broadcast %cst_4 : f32 to vector<16x128xf32>
    %12 = arith.maximumf %3, %11 : vector<16x128xf32>
    %13 = arith.subf %12, %10 : vector<16x128xf32>
    %14 = arith.addf %13, %9 : vector<16x128xf32>
    %cst_5 = arith.constant 2.000000e+00 : f32
    %15 = vector.broadcast %cst_5 : f32 to vector<16x128xf32>
    %16 = arith.mulf %15, %10 : vector<16x128xf32>
    %17 = arith.subf %3, %16 : vector<16x128xf32>
    %cst_6 = arith.constant 0.000000e+00 : f32
    %18 = vector.broadcast %cst_6 : f32 to vector<16x128xf32>
    %19 = arith.minimumf %17, %18 : vector<16x128xf32>
    %20 = arith.subf %19, %9 : vector<16x128xf32>
    %cst_7 = arith.constant 2.000000e+00 : f32
    %21 = vector.broadcast %cst_7 : f32 to vector<16x128xf32>
    %22 = arith.mulf %20, %21 : vector<16x128xf32>
    %23 = math.exp %22 : vector<16x128xf32>
    %24 = arith.mulf %23, %14 : vector<16x128xf32>
    %c1_i32 = arith.constant 1 : i32
    %25 = arith.muli %arg0, %c1_i32 : i32
    %26 = arith.addi %25, %arg1 : i32
    %c16_i32 = arith.constant 16 : i32
    %27 = arith.muli %26, %c16_i32 : i32
    %c16_i32_8 = arith.constant 16 : i32
    %28 = arith.subi %c16_i32_8, %27 : i32
    %c16_i32_9 = arith.constant 16 : i32
    %29 = arith.cmpi sge, %28, %c16_i32_9 : i32
    %30 = arith.extui %29 : i1 to i32
    %c0_i32_10 = arith.constant 0 : i32
    %31 = arith.cmpi ne, %30, %c0_i32_10 : i32
    scf.if %31 {
      %c0_14 = arith.constant 0 : index
      %c0_15 = arith.constant 0 : index
      %37 = vector.load %arg4[%c0_14, %c0_15] : memref<8x128xf32, #tpu.memory_space<vmem>>, vector<8x128xf32>
      %38 = vector.shape_cast %24 : vector<16x128xf32> to vector<2x8x128xf32>
      %cst_16 = arith.constant dense<0.000000e+00> : vector<8x128xf32>
      %39 = vector.multi_reduction <add>, %38, %cst_16 [0] : vector<2x8x128xf32> to vector<8x128xf32>
      %40 = arith.addf %37, %39 : vector<8x128xf32>
      %c0_17 = arith.constant 0 : index
      %c0_18 = arith.constant 0 : index
      %41 = vector.load %arg4[%c0_17, %c0_18] : memref<8x128xf32, #tpu.memory_space<vmem>>, vector<8x128xf32>
      tpu.vector_store %arg4[%c0_17, %c0_18], %40 {strides = array<i32>} : memref<8x128xf32, #tpu.memory_space<vmem>>, vector<8x128xf32>,
    } else {
    }
    %c0_i32_11 = arith.constant 0 : i32
    %32 = arith.cmpi sgt, %28, %c0_i32_11 : i32
    %c16_i32_12 = arith.constant 16 : i32
    %33 = arith.cmpi slt, %28, %c16_i32_12 : i32
    %34 = arith.andi %32, %33 : i1
    %35 = arith.extui %34 : i1 to i32
    %c0_i32_13 = arith.constant 0 : i32
    %36 = arith.cmpi ne, %35, %c0_i32_13 : i32
    scf.if %36 {
      %37 = tpu.iota {dimensions = array<i32: 0>} : vector<16x128xi32>
      %c0_14 = arith.constant 0 : index
      %c0_15 = arith.constant 0 : index
      %38 = vector.load %arg4[%c0_14, %c0_15] : memref<8x128xf32, #tpu.memory_space<vmem>>, vector<8x128xf32>
      %39 = vector.broadcast %28 : i32 to vector<16x128xi32>
      %40 = arith.cmpi slt, %37, %39 : vector<16x128xi32>
      %cst_16 = arith.constant 0.000000e+00 : f32
      %41 = vector.broadcast %cst_16 : f32 to vector<16x128xf32>
      %42 = arith.select %40, %24, %41 : vector<16x128xi1>, vector<16x128xf32>
      %43 = vector.shape_cast %42 : vector<16x128xf32> to vector<2x8x128xf32>
      %cst_17 = arith.constant dense<0.000000e+00> : vector<8x128xf32>
      %44 = vector.multi_reduction <add>, %43, %cst_17 [0] : vector<2x8x128xf32> to vector<8x128xf32>
      %45 = arith.addf %38, %44 : vector<8x128xf32>
      %c0_18 = arith.constant 0 : index
      %c0_19 = arith.constant 0 : index
      %46 = vector.load %arg4[%c0_18, %c0_19] : memref<8x128xf32, #tpu.memory_space<vmem>>, vector<8x128xf32>
      tpu.vector_store %arg4[%c0_18, %c0_19], %45 {strides = array<i32>} : memref<8x128xf32, #tpu.memory_space<vmem>>, vector<8x128xf32>,
    } else {
    }
    return
  }
  func.func @transform_0(%arg0: i32, %arg1: i32) -> (i32, i32) {
    %c1_i32 = arith.constant 1 : i32
    %0 = arith.muli %arg0, %c1_i32 : i32
    %1 = arith.addi %0, %arg1 : i32
    %c0_i32 = arith.constant 0 : i32
    %2 = arith.minsi %1, %c0_i32 : i32
    %c0_i32_0 = arith.constant 0 : i32
    %c0_i32_1 = arith.constant 0 : i32
    return %2, %c0_i32_0 : i32, i32
  }
  func.func @transform_1(%arg0: i32, %arg1: i32) -> (i32, i32) {
    %c1_i32 = arith.constant 1 : i32
    %0 = arith.muli %arg0, %c1_i32 : i32
    %1 = arith.addi %0, %arg1 : i32
    %c0_i32 = arith.constant 0 : i32
    %2 = arith.minsi %1, %c0_i32 : i32
    %c0_i32_0 = arith.constant 0 : i32
    %c0_i32_1 = arith.constant 0 : i32
    return %2, %c0_i32_0 : i32, i32
  }
  func.func @transform_2(%arg0: i32, %arg1: i32) -> (i32, i32) {
    %c0_i32 = arith.constant 0 : i32
    %c0_i32_0 = arith.constant 0 : i32
    return %arg0, %c0_i32 : i32, i32
  }
}

</mosaic_0001>

<bundles_post_ra>
// kernel: tpu_custom_call.1
= control target key start
LH: loop header
LB: loop body
LE: loop exit
PB: predicated region body
PF: predicated region fallthrough
CT: control target
= control target key end

     0   :  { %7 = vsyncpa [#allocation3], 0  ;;  %s314_s0 = inlined_call_operand.hbm [shape: f32[16,128], index: 0, kind: input, shape index: {}]   ;;  %s315_s1 = inlined_call_operand.hbm [shape: f32[16,128], index: 1, kind: input, shape index: {}]   ;;  %s316_s2 = inlined_call_operand.hbm [shape: f32[8,128], index: 2, kind: output, shape index: {}]  }
   0x1   :  { %8 = vsyncpa [#allocation6], 0 }
   0x2   :  { %9 = vsyncpa [#allocation4], 0  ;;  %s258_s9 = smov [#allocation2]   ;;  %s186_s13 = scalar_lea.hbm %s314_s0, 256 }
   0x3   :  { %s21_s10 = sshll.u32 %s258_s9, 4  ;;  %p187_p0 = scmp.ne.s32.totalorder %s314_s0, %s186_s13  ;;  %s22_s10 = int_to_ptr.vmem [resolvable:$true] %s21_s10 }
   0x4   :  { %p190_p1 = scmp.lt.u32.totalorder %s186_s13, %s314_s0 }
   0x6   :  { %p192_p2 = pnand %p190_p1, %p187_p0 }
   0x8   :  { %195 = shalt.err (!%p192_p2)
}
   0x9   :  { %s196_s18 = scalar_lea.vmem %s22_s10, 256  ;;  %p201_p4 = scmp.lt.s32.totalorder %s22_s10, %s22_s10 }
   0xa   :  { %p197_p3 = scmp.ne.s32.totalorder %s22_s10, %s196_s18  ;;  %p202_p5 = scmp.lt.s32.totalorder %s196_s18, %s196_s18 }
   0xc   :  { %p203_p6 = por %p202_p5, %p201_p4 }
   0xe   :  { %p204_p7 = pnand %p203_p6, %p197_p3 }
  0x10   :  { %207 = shalt.err (!%p204_p7)
}
  0x11   :  { %s259_s19 = smov 128   ;;  %s260_s20 = smov 8  }
  0x12   :  { %27 = dma.hbm_to_vmem [thread:$0]  %s314_s0, 256, %s22_s10, [#allocation3], %s259_s19, %s259_s19, %s260_s20  }
  0x13   :  { %s261_s23 = smov [#allocation5]   ;;  %s208_s27 = scalar_lea.hbm %s315_s1, 256 }
  0x14   :  { %s39_s24 = sshll.u32 %s261_s23, 4  ;;  %p209_p8 = scmp.ne.s32.totalorder %s315_s1, %s208_s27  ;;  %s40_s24 = int_to_ptr.vmem [resolvable:$true] %s39_s24 }
  0x15   :  { %p212_p9 = scmp.lt.u32.totalorder %s208_s27, %s315_s1 }
  0x17   :  { %p214_p10 = pnand %p212_p9, %p209_p8 }
  0x19   :  { %217 = shalt.err (!%p214_p10)
}
  0x1a   :  { %s218_s4 = scalar_lea.vmem %s40_s24, 256  ;;  %p223_p12 = scmp.lt.s32.totalorder %s40_s24, %s40_s24 }
  0x1b   :  { %p219_p11 = scmp.ne.s32.totalorder %s40_s24, %s218_s4  ;;  %p224_p13 = scmp.lt.s32.totalorder %s218_s4, %s218_s4 }
  0x1d   :  { %p225_p0 = por %p224_p13, %p223_p12 }
  0x1f   :  { %p226_p1 = pnand %p225_p0, %p219_p11 }
  0x21   :  { %229 = shalt.err (!%p226_p1)
}
  0x22   :  { %45 = dma.hbm_to_vmem [thread:$0]  %s315_s1, 256, %s40_s24, [#allocation6], %s259_s19, %s259_s19, %s260_s20  }
  0x23   :  { %252 = dma.done.wait [#allocation3], 256  }
  0x24   :  { %253 = vsyncadd [#allocation3], 4294967040 }
  0x25   :  { %254 = dma.done.wait [#allocation6], 256  }
  0x26   :  { %255 = vsyncadd [#allocation6], 4294967040  ;;  %v65_v0 = vld [vmem:[#allocation2] sm:$0xff]  ;;  %v66_v1 = vld [vmem:[#allocation2 + $0x8] sm:$0xff]  ;;  %s262_s1 = smov [#allocation7]  }
  0x27   :  { %v69_v2 = vand.u32 2147483647, %v65_v0  ;;  %v70_v3 = vand.u32 2147483647, %v66_v1  ;;  %v67_v8 = vld [vmem:[#allocation5] sm:$0xff]  ;;  %v68_v9 = vld [vmem:[#allocation5 + $0x8] sm:$0xff] }
  0x28   :  { %v95_v13 = vmul.f32 %v67_v8, %v65_v0  ;;  %v96_v15 = vmul.f32 %v68_v9, %v66_v1  ;;  %v97_v41 = vmax.f32 %v65_v0, 0.0  ;;  %v98_v43 = vmax.f32 %v66_v1, 0.0  ;;  %s154_s6 = sshll.u32 %s262_s1, 4  ;;  %s155_s6 = int_to_ptr.vmem [resolvable:$true] %s154_s6 }
  0x29   :  { %v71_v4 = vsub.f32 0.0, %v69_v2  ;;  %v72_v5 = vsub.f32 0.0, %v70_v3  ;;  %s230_s7 = scalar_lea.vmem %s155_s6, 128  ;;  %p235_p3 = scmp.lt.s32.totalorder %s155_s6, %s155_s6 }
  0x2a   :  { %v103_v18 = vmul.f32 2.0, %v95_v13  ;;  %v104_v19 = vmul.f32 2.0, %v96_v15  ;;  %v99_v44 = vsub.f32 %v97_v41, %v95_v13  ;;  %v100_v45 = vsub.f32 %v98_v43, %v96_v15  ;;  %p231_p2 = scmp.ne.s32.totalorder %s155_s6, %s230_s7  ;;  %p236_p4 = scmp.lt.s32.totalorder %s230_s7, %s230_s7 }
  0x2b   :  { %v73_v6 = vmul.f32 1.442695, %v71_v4  ;;  %v75_v7 = vmul.f32 1.442695, %v72_v5 }
  0x2c   :  { %v105_v23 = vsub.f32 %v65_v0, %v103_v18  ;;  %v106_v25 = vsub.f32 %v66_v1, %v104_v19  ;;  %p237_p5 = por %p236_p4, %p235_p3 }
  0x2d   :  { %174 = vpow2.f32 %v73_v6 }
  0x2e   :  { %176 = vpow2.f32 %v75_v7  ;;  %v107_v29 = vmin.f32 %v105_v23, 0.0  ;;  %v108_v32 = vmin.f32 %v106_v25, 0.0  ;;  %p238_p6 = pnand %p237_p5, %p231_p2 }
  0x37   :  { %v175_v10 = vpop.eup %174 }
  0x38   :  { %v177_v11 = vpop.eup %176  ;;  %v77_v12 = vadd.f32 1.0, %v175_v10  ;;  %v80_v16 = vmul.f32 -0.5, %v175_v10  ;;  %v83_v21 = vand.u32 2147483647, %v175_v10 }
  0x39   :  { %v86_v14 = vadd.f32 1.0, %v177_v11  ;;  %v89_v17 = vmul.f32 -0.5, %v177_v11  ;;  %v92_v24 = vand.u32 2147483647, %v177_v11 }
  0x3a   :  { %178 = vlog2.f32 %v77_v12  ;;  %v81_v20 = vadd.f32 1.0, %v80_v16  ;;  %vm84_vm0 = vcmp.lt.f32.partialorder %v83_v21, 0.0004427343 }
  0x3b   :  { %180 = vlog2.f32 %v86_v14  ;;  %v90_v22 = vadd.f32 1.0, %v89_v17  ;;  %vm93_vm1 = vcmp.lt.f32.partialorder %v92_v24, 0.0004427343 }
  0x3c   :  { %v82_v26 = vmul.f32 %v175_v10, %v81_v20 }
  0x3d   :  { %v91_v28 = vmul.f32 %v177_v11, %v90_v22 }
  0x44   :  { %v179_v27 = vpop.eup %178 }
  0x45   :  { %v181_v30 = vpop.eup %180  ;;  %v79_v31 = vmul.f32 0.6931472, %v179_v27 }
  0x46   :  { %v88_v33 = vmul.f32 0.6931472, %v181_v30 }
  0x47   :  { %v85_v34 = vsel %vm84_vm0, %v82_v26, %v79_v31 }
  0x48   :  { %v94_v35 = vsel %vm93_vm1, %v91_v28, %v88_v33  ;;  %v109_v36 = vsub.f32 %v107_v29, %v85_v34  ;;  %v101_v46 = vadd.f32 %v99_v44, %v85_v34 }
  0x49   :  { %v110_v37 = vsub.f32 %v108_v32, %v94_v35  ;;  %v102_v47 = vadd.f32 %v100_v45, %v94_v35 }
  0x4a   :  { %v111_v38 = vmul.f32 2.0, %v109_v36 }
  0x4b   :  { %v112_v39 = vmul.f32 2.0, %v110_v37 }
  0x4c   :  { %v113_v40 = vmul.f32 1.442695, %v111_v38 }
  0x4d   :  { %v115_v42 = vmul.f32 1.442695, %v112_v39 }
  0x4e   :  { %182 = vpow2.f32 %v113_v40 }
  0x4f   :  { %184 = vpow2.f32 %v115_v42 }
  0x58   :  { %v183_v48 = vpop.eup %182 }
  0x59   :  { %v185_v49 = vpop.eup %184  ;;  %v117_v50 = vmul.f32 %v183_v48, %v101_v46 }
  0x5a   :  { %v118_v51 = vmul.f32 %v185_v49, %v102_v47 }
  0x5c   :  { %v127_v52 = vadd.f32 %v118_v51, %v117_v50 }
  0x5e   :  { %129 = vst [vmem:[#allocation7] sm:$0xff] %v127_v52 }
  0x5f   :  { %241 = shalt.err (!%p238_p6)
}
  0x60   :  { %s242_s10 = scalar_lea.hbm %s316_s2, 128 }
  0x61   :  { %p243_p7 = scmp.ne.s32.totalorder %s316_s2, %s242_s10  ;;  %p246_p8 = scmp.lt.u32.totalorder %s242_s10, %s316_s2 }
  0x63   :  { %p248_p9 = pnand %p246_p8, %p243_p7 }
  0x65   :  { %251 = shalt.err (!%p248_p9)
}
  0x66   :  { %157 = dma.vmem_to_hbm [thread:$0]  %s155_s6, 128, %s316_s2, [#allocation4]  }
  0x67   :  { %256 = dma.done.wait [#allocation4], 128  }
  0x68   :  { %257 = vsyncadd [#allocation4], 4294967168 }
  0x69   :  { %161 = vsyncpa [#allocation3], 1 }
  0x6a   :  { %162 = vsyncpa [#allocation6], 1 }
  0x6b   :  { %163 = vsyncpa [#allocation4], 1 }

</bundles_post_ra>
